<compile_context>
chip_gen: v6e
topology: v6e:2x2x1
jax: 0.10.0
libtpu: 0.0.40
codegen_flags: <defaults>
</compile_context>

<pallas_src>
import jax
import jax.numpy as jnp
from jax.experimental import pallas as pl
from jax.experimental.pallas import tpu as pltpu


def mlp_kernel(x_ref, w1_ref, b1_ref, w2_ref, b2_ref, w3_ref, b3_ref, o_ref):
    # x_ref : (2, tm)     batch on lanes
    # w1    : (d1p, 2)    b1: (d1p, 1)
    # w2    : (d1p, d1p)  b2: (d1p, 1)
    # w3    : (1, d1p)    b3: (1,) scalar in SMEM
    # o_ref : (1, tm)     lane-dense output tile
    x = x_ref[...]

    # fc1 + relu (MXU): (d1p, 2) @ (2, tm) -> (d1p, tm)
    h1 = jnp.dot(w1_ref[...], x, preferred_element_type=jnp.float32) + b1_ref[...]
    h1 = jnp.maximum(h1, 0.0)

    # fc12 + relu (MXU): (d1p, d1p) @ (d1p, tm) -> (d1p, tm)
    h2 = jnp.dot(w2_ref[...], h1, preferred_element_type=jnp.float32) + b2_ref[...]
    h2 = jnp.maximum(h2, 0.0)

    # fc2 (MXU): (1, d1p) @ (d1p, tm) -> (1, tm); bias is an SMEM scalar
    z = jnp.dot(w3_ref[...], h2, preferred_element_type=jnp.float32) + b3_ref[0]

    # sigmoid = 1 / (1 + exp(-z)); exp and approx-reciprocal both ride the idle EUP slot
    o_ref[...] = pl.reciprocal(1.0 + jnp.exp(-z), approx=True)


def nn_classifier_forward(x, params, *, tm=32768):
    """Forward pass. x: (N, 2) float32 (any N). Returns (N,) float32 probabilities."""
    w1, b1, w2, b2, w3, b3 = params
    N, fin = x.shape
    d1 = w1.shape[0]
    d1p = pl.cdiv(d1, 8) * 8                      # hidden width rounded to sublane granule

    assert tm % 128 == 0, "tm must be a multiple of 128 (lane width)"
    lanes = pl.cdiv(N, 128) * 128                 # batch rounded up to whole vreg lanes
    tm_eff = min(tm, lanes)
    if lanes >= 256 and pl.cdiv(lanes, tm_eff) < 2:
        # keep >= 2 grid steps so v7x's two TensorCores both get work
        tm_eff = pl.cdiv(lanes, 2 * 128) * 128
    n_blocks = pl.cdiv(N, tm_eff)

    # Batch-on-lanes input. Partial tail block is masked by Pallas, so no zero-pad
    # materialization and no post-kernel slice.
    x_t = x.T.astype(jnp.float32)                 # (2, N)

    # Zero-pad the tiny params to d1p rows/cols (padding rows stay 0 through ReLU).
    w1p = jnp.zeros((d1p, fin), jnp.float32).at[:d1, :].set(w1)
    b1p = jnp.zeros((d1p, 1), jnp.float32).at[:d1, 0].set(b1)
    w2p = jnp.zeros((d1p, d1p), jnp.float32).at[:d1, :d1].set(w2)
    b2p = jnp.zeros((d1p, 1), jnp.float32).at[:d1, 0].set(b2)
    w3p = jnp.zeros((1, d1p), jnp.float32).at[:, :d1].set(w3)
    b3p = b3.reshape((1,)).astype(jnp.float32)

    flops = 2 * N * (fin * d1 + d1 * d1 + d1)
    # Kernel HBM traffic: 8 B/sample in + 4 B/sample out + (tiny) resident weights.
    bytes_accessed = 4 * N * (fin + 1) + 4 * int(
        w1p.size + b1p.size + w2p.size + b2p.size + w3p.size + b3p.size)

    out = pl.pallas_call(
        mlp_kernel,
        out_shape=jax.ShapeDtypeStruct((1, N), jnp.float32),
        grid_spec=pltpu.PrefetchScalarGridSpec(
            num_scalar_prefetch=0,
            grid=(n_blocks,),
            in_specs=[
                pl.BlockSpec((fin, tm_eff), lambda i: (0, i)),        # x tile, batch on lanes
                pl.BlockSpec((d1p, fin), lambda i: (0, 0)),           # fc1 weight (resident)
                pl.BlockSpec((d1p, 1), lambda i: (0, 0)),             # fc1 bias column
                pl.BlockSpec((d1p, d1p), lambda i: (0, 0)),           # fc12 weight
                pl.BlockSpec((d1p, 1), lambda i: (0, 0)),             # fc12 bias column
                pl.BlockSpec((1, d1p), lambda i: (0, 0)),             # fc2 weight row
                pl.BlockSpec(memory_space=pltpu.MemorySpace.SMEM),    # fc2 bias scalar
            ],
            out_specs=pl.BlockSpec((1, tm_eff), lambda i: (0, i)),    # lane-dense output
        ),
        compiler_params=pltpu.CompilerParams(
            dimension_semantics=("parallel",),        # independent batch tiles (v7x: 2 TCs)
            vmem_limit_bytes=32 * 1024 * 1024,
        ),
        cost_estimate=pl.CostEstimate(
            flops=flops, transcendentals=2 * N, bytes_accessed=bytes_accessed),
    )(x_t, w1p, b1p, w2p, b2p, w3p, b3p)

    return out.reshape(N)                           # matches torch .ravel() -> (N,)


def init_params(key, d1=10):
    """PyTorch-convention params: w (out, in), b (out,), mimicking nn.Linear default
    U(-1/sqrt(fan_in), +1/sqrt(fan_in)) init."""
    def linear(k, fan_in, fan_out):
        kw, kb = jax.random.split(k)
        bound = 1.0 / (fan_in ** 0.5)
        w = jax.random.uniform(kw, (fan_out, fan_in), jnp.float32, -bound, bound)
        b = jax.random.uniform(kb, (fan_out,), jnp.float32, -bound, bound)
        return w, b

    k1, k2, k3 = jax.random.split(key, 3)
    w1, b1 = linear(k1, 2, d1)
    w2, b2 = linear(k2, d1, d1)
    w3, b3 = linear(k3, d1, 1)
    return (w1, b1, w2, b2, w3, b3)


def reference_forward(x, params):
    """Pure-JAX reference mirroring the torch module."""
    w1, b1, w2, b2, w3, b3 = params
    h = jnp.maximum(x @ w1.T + b1, 0.0)
    h = jnp.maximum(h @ w2.T + b2, 0.0)
    z = h @ w3.T + b3
    return jax.nn.sigmoid(z).ravel()


if __name__ == "__main__":
    key = jax.random.PRNGKey(0)
    kx, kp = jax.random.split(key)

    # N deliberately NOT a multiple of 128 / tm to exercise the multi-block + masked
    # tail-block path (with N=300 the wrapper picks tm_eff=256, grid=(2,)).
    N, d1 = 300, 10
    x = jax.random.normal(kx, (N, 2), jnp.float32)
    params = init_params(kp, d1=d1)

    y = nn_classifier_forward(x, params)
    y = jax.block_until_ready(y)

    y_ref = reference_forward(x, params)
    assert y.shape == (N,)
    # Tolerance 1e-3: approx (EUP) reciprocal in the sigmoid has ~1e-4 relative error.
    assert jnp.allclose(y, y_ref, atol=1e-3, rtol=1e-3), "mismatch vs JAX reference"

    # predict() equivalent: thresholding is plain JAX glue outside the kernel.
    _ = jax.block_until_ready(y > 0.5)

    print("KERNEL_OK")
</pallas_src>

<mosaic_0001>
module attributes {stable_mosaic.version = 11 : i64} {
  func.func @mlp_kernel(%arg0: i32, %arg1: memref<2x256xf32, #tpu.memory_space<vmem>>, %arg2: memref<16x2xf32, #tpu.memory_space<vmem>>, %arg3: memref<16x1xf32, #tpu.memory_space<vmem>>, %arg4: memref<16x16xf32, #tpu.memory_space<vmem>>, %arg5: memref<16x1xf32, #tpu.memory_space<vmem>>, %arg6: memref<1x16xf32, #tpu.memory_space<vmem>>, %arg7: memref<1xf32, #tpu.memory_space<smem>>, %arg8: memref<1x256xf32, #tpu.memory_space<vmem>>) attributes {dimension_semantics = [#tpu.dimension_semantics<parallel>], iteration_bounds = array<i64: 2>, scalar_prefetch = 0 : i64, scratch_operands = 0 : i64, tpu.core_type = #tpu.core_type<tc>, window_params = [{transform_indices = @transform_0, window_bounds = array<i64: 2, 256>}, {pipeline_mode = #tpu.pipeline_mode<synchronous>, transform_indices = @transform_1, window_bounds = array<i64: 16, 2>}, {pipeline_mode = #tpu.pipeline_mode<synchronous>, transform_indices = @transform_2, window_bounds = array<i64: 16, 1>}, {pipeline_mode = #tpu.pipeline_mode<synchronous>, transform_indices = @transform_3, window_bounds = array<i64: 16, 16>}, {pipeline_mode = #tpu.pipeline_mode<synchronous>, transform_indices = @transform_4, window_bounds = array<i64: 16, 1>}, {pipeline_mode = #tpu.pipeline_mode<synchronous>, transform_indices = @transform_5, window_bounds = array<i64: 1, 16>}, {transform_indices = @transform_6, window_bounds = array<i64: 1>}, {transform_indices = @transform_7, window_bounds = array<i64: 1, 256>}]} {
    %c0 = arith.constant 0 : index
    %c0_0 = arith.constant 0 : index
    %0 = vector.load %arg1[%c0, %c0_0] : memref<2x256xf32, #tpu.memory_space<vmem>>, vector<2x256xf32>
    %c0_1 = arith.constant 0 : index
    %c0_2 = arith.constant 0 : index
    %1 = vector.load %arg2[%c0_1, %c0_2] : memref<16x2xf32, #tpu.memory_space<vmem>>, vector<16x2xf32>
    %cst = arith.constant dense<0.000000e+00> : vector<16x256xf32>
    %2 = tpu.matmul %1, %0, %cst {dimension_numbers = #tpu.dot_dimension_numbers<[1], [0], [0], [1], [0, 0, 1, 1], [], []>} : vector<16x2xf32>, vector<2x256xf32>, vector<16x256xf32> -> vector<16x256xf32>
    %c0_3 = arith.constant 0 : index
    %c0_4 = arith.constant 0 : index
    %3 = vector.load %arg3[%c0_3, %c0_4] : memref<16x1xf32, #tpu.memory_space<vmem>>, vector<16x1xf32>
    %4 = vector.broadcast %3 : vector<16x1xf32> to vector<16x256xf32>
    %5 = arith.addf %2, %4 : vector<16x256xf32>
    %cst_5 = arith.constant 0.000000e+00 : f32
    %6 = vector.broadcast %cst_5 : f32 to vector<16x256xf32>
    %7 = arith.maximumf %5, %6 : vector<16x256xf32>
    %c0_6 = arith.constant 0 : index
    %c0_7 = arith.constant 0 : index
    %8 = vector.load %arg4[%c0_6, %c0_7] : memref<16x16xf32, #tpu.memory_space<vmem>>, vector<16x16xf32>
    %cst_8 = arith.constant dense<0.000000e+00> : vector<16x256xf32>
    %9 = tpu.matmul %8, %7, %cst_8 {dimension_numbers = #tpu.dot_dimension_numbers<[1], [0], [0], [1], [0, 0, 1, 1], [], []>} : vector<16x16xf32>, vector<16x256xf32>, vector<16x256xf32> -> vector<16x256xf32>
    %c0_9 = arith.constant 0 : index
    %c0_10 = arith.constant 0 : index
    %10 = vector.load %arg5[%c0_9, %c0_10] : memref<16x1xf32, #tpu.memory_space<vmem>>, vector<16x1xf32>
    %11 = vector.broadcast %10 : vector<16x1xf32> to vector<16x256xf32>
    %12 = arith.addf %9, %11 : vector<16x256xf32>
    %cst_11 = arith.constant 0.000000e+00 : f32
    %13 = vector.broadcast %cst_11 : f32 to vector<16x256xf32>
    %14 = arith.maximumf %12, %13 : vector<16x256xf32>
    %c0_12 = arith.constant 0 : index
    %c0_13 = arith.constant 0 : index
    %15 = vector.load %arg6[%c0_12, %c0_13] : memref<1x16xf32, #tpu.memory_space<vmem>>, vector<1x16xf32>
    %cst_14 = arith.constant dense<0.000000e+00> : vector<1x256xf32>
    %16 = tpu.matmul %15, %14, %cst_14 {dimension_numbers = #tpu.dot_dimension_numbers<[1], [0], [0], [1], [0, 0, 1, 1], [], []>} : vector<1x16xf32>, vector<16x256xf32>, vector<1x256xf32> -> vector<1x256xf32>
    %c0_15 = arith.constant 0 : index
    %17 = memref.load %arg7[%c0_15] : memref<1xf32, #tpu.memory_space<smem>>
    %18 = vector.broadcast %17 : f32 to vector<1x256xf32>
    %19 = arith.addf %16, %18 : vector<1x256xf32>
    %cst_16 = arith.constant 0.000000e+00 : f32
    %20 = vector.broadcast %cst_16 : f32 to vector<1x256xf32>
    %21 = arith.subf %20, %19 : vector<1x256xf32>
    %22 = math.exp %21 : vector<1x256xf32>
    %cst_17 = arith.constant 1.000000e+00 : f32
    %23 = vector.broadcast %cst_17 : f32 to vector<1x256xf32>
    %24 = arith.addf %23, %22 : vector<1x256xf32>
    %25 = tpu.reciprocal %24 {approx = true} : vector<1x256xf32> -> vector<1x256xf32>
    %c0_18 = arith.constant 0 : index
    %c0_19 = arith.constant 0 : index
    %26 = vector.load %arg8[%c0_18, %c0_19] : memref<1x256xf32, #tpu.memory_space<vmem>>, vector<1x256xf32>
    tpu.vector_store %arg8[%c0_18, %c0_19], %25 {strides = array<i32>} : memref<1x256xf32, #tpu.memory_space<vmem>>, vector<1x256xf32>,
    return
  }
  func.func @transform_0(%arg0: i32) -> (i32, i32) {
    %c0_i32 = arith.constant 0 : i32
    %c0_i32_0 = arith.constant 0 : i32
    return %c0_i32, %arg0 : i32, i32
  }
  func.func @transform_1(%arg0: i32) -> (i32, i32) {
    %c0_i32 = arith.constant 0 : i32
    %c0_i32_0 = arith.constant 0 : i32
    %c0_i32_1 = arith.constant 0 : i32
    return %c0_i32, %c0_i32_0 : i32, i32
  }
  func.func @transform_2(%arg0: i32) -> (i32, i32) {
    %c0_i32 = arith.constant 0 : i32
    %c0_i32_0 = arith.constant 0 : i32
    %c0_i32_1 = arith.constant 0 : i32
    return %c0_i32, %c0_i32_0 : i32, i32
  }
  func.func @transform_3(%arg0: i32) -> (i32, i32) {
    %c0_i32 = arith.constant 0 : i32
    %c0_i32_0 = arith.constant 0 : i32
    %c0_i32_1 = arith.constant 0 : i32
    return %c0_i32, %c0_i32_0 : i32, i32
  }
  func.func @transform_4(%arg0: i32) -> (i32, i32) {
    %c0_i32 = arith.constant 0 : i32
    %c0_i32_0 = arith.constant 0 : i32
    %c0_i32_1 = arith.constant 0 : i32
    return %c0_i32, %c0_i32_0 : i32, i32
  }
  func.func @transform_5(%arg0: i32) -> (i32, i32) {
    %c0_i32 = arith.constant 0 : i32
    %c0_i32_0 = arith.constant 0 : i32
    %c0_i32_1 = arith.constant 0 : i32
    return %c0_i32, %c0_i32_0 : i32, i32
  }
  func.func @transform_6(%arg0: i32) -> i32 {
    %c0_i32 = arith.constant 0 : i32
    %c0_i32_0 = arith.constant 0 : i32
    return %c0_i32 : i32
  }
  func.func @transform_7(%arg0: i32) -> (i32, i32) {
    %c0_i32 = arith.constant 0 : i32
    %c0_i32_0 = arith.constant 0 : i32
    return %c0_i32, %arg0 : i32, i32
  }
}

</mosaic_0001>

<bundles_post_ra>
// kernel: tpu_custom_call.1
= control target key start
LH: loop header
LB: loop body
LE: loop exit
PB: predicated region body
PF: predicated region fallthrough
CT: control target
= control target key end

     0   :  { %s1034_s0 = inlined_call_operand.vmem [shape: f32[2,300], index: 0, kind: input, shape index: {}]   ;;  %s1035_s1 = inlined_call_operand.vmem [shape: f32[16,2], index: 1, kind: input, shape index: {}]   ;;  %s1036_s2 = inlined_call_operand.vmem [shape: f32[16,1], index: 2, kind: input, shape index: {}]   ;;  %s1037_s3 = inlined_call_operand.vmem [shape: f32[16,16], index: 3, kind: input, shape index: {}]   ;;  %s1038_s4 = inlined_call_operand.vmem [shape: f32[16,1], index: 4, kind: input, shape index: {}]   ;;  %s1039_s5 = inlined_call_operand.vmem [shape: f32[1,16], index: 5, kind: input, shape index: {}]   ;;  %s1040_s6 = inlined_call_operand.<no memory space> [shape: f32[1], index: 6, kind: input, shape index: {}]   ;;  %s1041_s7 = inlined_call_operand.hbm [shape: f32[1,300], index: 7, kind: output, shape index: {}]  }
   0x1   :  { %12 = sst [smem:[#allocation2]] %s1040_s6 }
   0x2   :  { %13 = vsyncpa [#allocation4], 0 }
   0x3   :  { %15 = vsyncpa [#allocation4 + $0x1], 0  ;;  %s896_s26 = smov 0   ;;  %s898_s27 = smov 0  }
   0x4   :  { %s900_s28 = smov 0   ;;  %s902_s29 = smov 0  }
   0x5 LB: > { %s917_s6 = sadd.s32 4294967295, %s847_s29   ;;  %s713_s30 = sadd.s32 4294967294, %s847_s29   ;;  %s847_s29 = sphi %s902_s29, %s1047_s29   ;;  %s843_s28 = sphi %s900_s28, %s1046_s28   ;;  %s839_s27 = sphi %s898_s27, %s1045_s27   ;;  %s835_s26 = sphi %s896_s26, %s1044_s26  }
   0x6   : > { %s921_s8 = sadd.s32 1, %s847_s29   ;;  %s180_s9 = sadd.s32 1, %s843_s28 }
   0x7   : > { %s177_s10 = ssub.s32 %s847_s29, %s921_s8  ;;  %p190_p0 = scmp.ne.s32.totalorder %s843_s28, %s839_s27 }
   0x8   : > { %p178_p1 = scmp.eq.s32.totalorder %s177_s10, 0  ;;  %p191_p2 = scmp.eq.s32.totalorder %s917_s6, 1 }
   0x9   : > { %p196_p3 = scmp.ne.s32.totalorder %s839_s27, %s835_s26  ;;  %p197_p4 = scmp.eq.s32.totalorder %s713_s30, 1 }
   0xa   : > { %s932_s11 = scalar_select %p178_p1, %s843_s28, %s180_s9  }
   0xb   : > { %p934_p5 = por %p191_p2, %p190_p0  ;;  %p938_p6 = por %p197_p4, %p196_p3 }
   0xc   : > { %p716_p7 = scmp.ge.s32.totalorder %s847_s29, 1  ;;  %p250_p8 = scmp.lt.s32.totalorder %s847_s29, 3 }
   0xe   : > { %p251_p9 = pnand %p716_p7, %p250_p8 }
   0xf   : > { %s945_s14 = sshll.u32 (!%p251_p9), %s917_s6, 1  ;;  %s283_s24 = sand.u32 (!%p251_p9), 1, %s839_s27  }
  0x10   : > { %254 = sbr.rel (%p251_p9) target bundleno = 708 (0x2c4), region = 48  ;;  %p291_p10 = scmp.lt.s32.totalorder (!%p251_p9), %s945_s14, 2 }
  0x11   : > { %s525_s25 = sld [smem:[#allocation2]] (!%p251_p9)  ;;  %s717_s30 = sshll.u32 (!%p251_p9), %s283_s24, 1 }
  0x12   : > { %s285_s9 = scalar_lea.vmem (!%p251_p9), [#allocation3], %s717_s30  ;;  %s987_s10 = scalar_lea.sflag (!%p251_p9), [#allocation4], %s283_s24 }
  0x15   : > { %v849_v0 = vmov 0.0   ;;  %v309_v1 = vld [vmem:[%s1036_s2 + $0x8] sm:$0xff]  ;;  %v850_v2 = vmov 0   ;;  %s292_s17 = scalar_select %p291_p10, %s945_s14, 2  ;;  %v308_v3 = vld [vmem:[%s1036_s2] sm:$0xff]  ;;  %vm336_vm0 = vcmask 1041408   ;;  %v617_v56 = vlaneseq }
  0x16   : > { %405 = vmatprep.mubr.f32.mxu0 %v849_v0  ;;  %507 = vmatprep.mubr.f32.mxu1 %v849_v0  ;;  %v306_v6 = vld [vmem:[%s1035_s1] sm:$0xff]  ;;  %vm329_vm1 = vcmask 15360   ;;  %v307_v7 = vld [vmem:[%s1035_s1 + $0x8] sm:$0xff]  ;;  %vm436_vm2 = vcmask 130048   ;;  %v851_v54 = vmov 1966171168  }
  0x17   : > { %777 = vset.pattern.permute.xlu0 %v850_v2  ;;  %778 = vset.pattern.permute.xlu1 %v850_v2  ;;  %s719_s20 = sshll.u32 %s292_s17, 1  ;;  %v425_v8 = vld [vmem:[%s1038_s4 + $0x8] sm:$0xff]  ;;  %v424_v9 = vld [vmem:[%s1038_s4] sm:$0xff]  ;;  %v526_v41 = vstv %s525_s25  ;;  %v615_v55 = vunpack.c.l.s4 %v851_v54  ;;  %v618_v58 = vshrl.u32 %v617_v56, 7  ;;  %vm631_vm3 = vcmp.lt.s32.totalorder %v617_v56, 256  ;;  %s643_s15 = ssub.s32 (%p934_p5), 3, %s945_s14 }
  0x18   : > { %317 = vperm.xlu0 %777, %v309_v1   ;;  %s294_s23 = scalar_lea.vmem %s1034_s0, %s719_s20  ;;  %433 = vperm.xlu1 %778, %v425_v8   ;;  %v422_v24 = vld [vmem:[%s1037_s3] sm:$0xff]  ;;  %v423_v25 = vld [vmem:[%s1037_s3 + $0x8] sm:$0xff]  ;;  %p644_p11 = scmp.lt.s32.totalorder (%p934_p5), %s643_s15, 2 }
  0x19   : > { %v720_v4 = vld.sshfl [vmem:[%s294_s23] sm:$0x33 pattern:$0x76325410]  ;;  %v616_v57 = vunpack.c.0.s8 %v615_v55 }
  0x1a   : > { %v328_v5 = vcombine.high %v720_v4, %v720_v4  ;;  %v524_v40 = vld [vmem:[%s1039_s5] sm:$0x1] }
  0x1b   : > { %v619_v60 = vsub.s32 %v616_v57, %v618_v58 }
  0x1c   : > { %312 = vperm.xlu0 %777, %v308_v3   ;;  %721 = vmatprep.subr.msk.mxu0 %vm336_vm0, %v328_v5 }
  0x1d   : > { %722 = vmatpush1.msk.msra.mxu0 %vm336_vm0, %v720_v4  ;;  %428 = vperm.xlu1 %778, %v424_v9  }
  0x1e   : > { %723 = vmatmul.mubr.msk.f32.vlgmr.msra.gmra.mxu0 %vm329_vm1, %v306_v6 }
  0x1f   : > { %411 = vmatprep.mubr.f32.mxu0 %v849_v0 }
  0x22   : > { %724 = vmatmul.mubr.msk.f32.gmra.mxu0 %vm329_vm1, %v307_v7 }
  0x23   : > { %594 = vmatprep.mubr.f32.mxu0 %v849_v0 }
  0x93   : > { %v318_v10 = vpop.permute.xlu0 %317  ;;  %v434_v26 = vpop.permute.xlu1 %433 }
  0x97   : > { %v313_v14 = vpop.permute.xlu0 %312 }
  0x98   : > { %v429_v30 = vpop.permute.xlu1 %428 }
  0xde   : > { %v407_v11 = vpop.f32.mrf.mxu0 }
  0xdf   : > { %v408_v19 = vadd.f32 %v407_v11, %v313_v14 }
  0xe0   : > { %v409_v12 = vpop.f32.mrf.mxu0 }
  0xe1   : > { %v410_v17 = vadd.f32 %v409_v12, %v313_v14  ;;  %v418_v23 = vmax.f32 %v408_v19, 0.0 }
  0xe2   : > { %v413_v13 = vpop.f32.mrf.mxu0 }
  0xe3   : > { %v414_v15 = vadd.f32 %v413_v13, %v318_v10  ;;  %v419_v22 = vmax.f32 %v410_v17, 0.0 }
  0xe4   : > { %v415_v16 = vpop.f32.mrf.mxu0 }
  0xe5   : > { %v416_v18 = vadd.f32 %v415_v16, %v318_v10  ;;  %v420_v21 = vmax.f32 %v414_v15, 0.0 }
  0xe7   : > { %v421_v20 = vmax.f32 %v416_v18, 0.0 }
  0xe9   : > { %471 = vmatprep.subr.mxu1 %v421_v20 }
  0xea   : > { %472 = vmatpush1.msra.mxu1 %v420_v21 }
  0xeb   : > { %473 = vmatprep.subr.mxu1 %v419_v22 }
  0xec   : > { %474 = vmatpush1.msra.mxu1 %v418_v23 }
  0xed   : > { %725 = vmatmul.mubr.msk.f32.vlgmr.msra.gmra.mxu1 %vm436_vm2, %v422_v24 }
  0xee   : > { %513 = vmatprep.mubr.f32.mxu1 %v849_v0 }
  0xf1   : > { %726 = vmatmul.mubr.msk.f32.gmra.mxu1 %vm436_vm2, %v423_v25 }
 0x1ad   : > { %v509_v27 = vpop.f32.mrf.mxu1 }
 0x1ae   : > { %v510_v35 = vadd.f32 %v509_v27, %v429_v30 }
 0x1af   : > { %v511_v28 = vpop.f32.mrf.mxu1 }
 0x1b0   : > { %v512_v33 = vadd.f32 %v511_v28, %v429_v30  ;;  %v520_v39 = vmax.f32 %v510_v35, 0.0 }
 0x1b1   : > { %v515_v29 = vpop.f32.mrf.mxu1 }
 0x1b2   : > { %v516_v31 = vadd.f32 %v515_v29, %v434_v26  ;;  %v521_v38 = vmax.f32 %v512_v33, 0.0 }
 0x1b3   : > { %v517_v32 = vpop.f32.mrf.mxu1 }
 0x1b4   : > { %v518_v34 = vadd.f32 %v517_v32, %v434_v26  ;;  %v522_v37 = vmax.f32 %v516_v31, 0.0 }
 0x1b6   : > { %v523_v36 = vmax.f32 %v518_v34, 0.0 }
 0x1b8   : > { %558 = vmatprep.subr.mxu0 %v523_v36 }
 0x1b9   : > { %559 = vmatpush1.msra.mxu0 %v522_v37 }
 0x1ba   : > { %560 = vmatprep.subr.mxu0 %v521_v38 }
 0x1bb   : > { %561 = vmatpush1.msra.mxu0 %v520_v39 }
 0x1bc   : > { %727 = vmatmul.mubr.msk.f32.vlgmr.msra.gmra.mxu0 %vm436_vm2, %v524_v40 }
 0x27c   : > { %v596_v42 = vpop.f32.mrf.mxu0 }
 0x27d   : > { %v597_v43 = vadd.f32 %v596_v42, %v526_v41 }
 0x27e   : > { %v598_v44 = vpop.f32.mrf.mxu0 }
 0x27f   : > { %v601_v45 = vsub.f32 0.0, %v597_v43  ;;  %v599_v46 = vadd.f32 %v598_v44, %v526_v41 }
 0x281   : > { %v603_v47 = vmul.f32 1.442695, %v601_v45  ;;  %v602_v48 = vsub.f32 0.0, %v599_v46 }
 0x283   : > { %779 = vpow2.f32 %v603_v47  ;;  %v605_v49 = vmul.f32 1.442695, %v602_v48 }
 0x285   : > { %781 = vpow2.f32 %v605_v49 }
 0x290   : > { %v780_v50 = vpop.eup %779 }
 0x291   : > { %v607_v51 = vadd.f32 1.0, %v780_v50 }
 0x292   : > { %v782_v52 = vpop.eup %781 }
 0x293   : > { %v608_v53 = vadd.f32 1.0, %v782_v52  ;;  %783 = vrcp.f32 %v607_v51 }
 0x295   : > { %785 = vrcp.f32 %v608_v53 }
 0x2a0   : > { %v784_v59 = vpop.eup %783 }
 0x2a2   : > { %v786_v61 = vpop.eup %785 }
 0x2a3   : > { %v613_v62 = vcombine.low %v784_v59, %v786_v61 }
 0x2a5   : > { %v620_v63 = vrot.slane %v613_v62, %v619_v60  ;;  %641 = sbr.rel (!%p934_p5) target bundleno = 708 (0x2c4), region = 52 }
 0x2a7   : > { %v627_v0 = vrot.slane %v620_v63, %v619_v60 }
 0x2a9   : > { %633 = vst.msk [vmem:[%s285_s9] sm:$0x3] %vm631_vm3, %v627_v0 }
 0x2aa   : > { %s1049_s15 = smov (!%p644_p11, %s643_s15), 2 }
 0x2ab   : > { %s992_s16 = sshll.u32 %s1049_s15, 4 }
 0x2ac   : > { %s648_s17 = ssub.s32 32, %s992_s16 }
 0x2ad   : > { %649 = vsyncadd %s987_s10, %s648_s17  ;;  %p731_p12 = scmp.ne.s32.totalorder %s992_s16, 0  ;;  %s735_s18 = sshll.u32 %s917_s6, 5 }
 0x2ae   : > { %s652_s12 = scalar_lea.hbm %s1041_s7, %s735_s18  ;;  %s654_s21 = sshll.u32 %s285_s9, 4  ;;  %s655_s21 = int_to_ptr.vmem [resolvable:$true] %s654_s21 }
 0x2af   : > { %s787_s14 = scalar_lea.vmem %s655_s21, %s992_s16  ;;  %s852_s22 = smov [#allocation3]  }
 0x2b0   : > { %p788_p13 = scmp.ne.s32.totalorder %s655_s21, %s787_s14  ;;  %s791_s23 = sshll.u32 %s852_s22, 4  ;;  %s792_s23 = int_to_ptr.vmem [resolvable:$false] %s791_s23 }
 0x2b1   : > { %s793_s24 = scalar_lea.vmem %s792_s23, 64  ;;  %p794_p2 = scmp.lt.s32.totalorder %s655_s21, %s792_s23 }
 0x2b2   : > { %p789_p0 = pnand %p788_p13, %p731_p12  ;;  %p795_p3 = scmp.lt.s32.totalorder %s793_s24, %s787_s14 }
 0x2b4   : > { %p790_p1 = pneg %p789_p0  ;;  %p796_p4 = por %p795_p3, %p794_p2 }
 0x2b6   : > { %p797_p5 = pnand %p796_p4, %p790_p1 }
 0x2b8   : > { %800 = shalt.err (!%p797_p5)
}
 0x2b9   : > { %s801_s6 = scalar_lea.hbm %s652_s12, %s992_s16  ;;  %s805_s9 = scalar_lea.hbm %s1041_s7, 48 }
 0x2ba   : > { %p802_p7 = scmp.ne.s32.totalorder %s652_s12, %s801_s6  ;;  %p806_p10 = scmp.lt.s32.totalorder %s652_s12, %s1041_s7 }
 0x2bb   : > { %p807_p11 = scmp.lt.s32.totalorder %s805_s9, %s801_s6 }
 0x2bc   : > { %p803_p8 = pnand %p802_p7, %p731_p12 }
 0x2bd   : > { %p808_p13 = por %p807_p11, %p806_p10 }
 0x2be   : > { %p804_p9 = pneg %p803_p8 }
 0x2c0   : > { %p809_p0 = pnand %p808_p13, %p804_p9 }
 0x2c2   : > { %812 = shalt.err (!%p809_p0)
}
 0x2c3   : > { %657 = dma.vmem_to_hbm [thread:$0]  (%p731_p12), %s655_s21, %s992_s16, %s652_s12, %s987_s10  }
 0x2c4 PF: > { %p741_p1 = scmp.ge.s32.totalorder %s847_s29, 2  ;;  %s666_s18 = sand.u32 1, %s835_s26  }
 0x2c5   : > { %s667_s19 = scalar_lea.sflag [#allocation4], %s666_s18 }
 0x2c6   : > { %p738_p2 = pnand %p741_p1, %p938_p6 }
 0x2c8   : > { %p739_p3 = pneg %p738_p2 }
 0x2ca   : > { %830 = dma.done.wait (%p739_p3), %s667_s19, 32  }
 0x2cb   : > { %832 = vsyncadd (%p739_p3), %s667_s19, 4294967264  ;;  %p18_p4 = scmp.ge.s32.totalorder %s921_s8, 4   ;;  %s1044_s26 = smov %s839_s27 }
 0x2cc   : > { %s1045_s27 = smov %s843_s28  ;;  %s1046_s28 = smov %s932_s11 }
 0x2cd   : > { %s1047_s29 = smov %s921_s8  ;;  %20 = sbr.rel (!%p18_p4) target bundleno = 5 (0x5), region = 83 }
 0x2d2   :  { %672 = vsyncpa [#allocation4], 1 }
 0x2d3   :  { %674 = vsyncpa [#allocation4 + $0x1], 1 }

</bundles_post_ra>
